<compile_context>
chip_gen: v6e
topology: v6e:2x2x1
jax: 0.10.0
libtpu: 0.0.40
codegen_flags: <defaults>
</compile_context>

<pallas_src>
import functools

import jax
import jax.numpy as jnp
from jax.experimental import pallas as pl
from jax.experimental.pallas import tpu as pltpu


def _round_up(n, m):
    return (n + m - 1) // m * m


def _ffnet_kernel(x_ref, w1_ref, b1_ref, w2_ref, b2_ref, w3_ref, b3_ref, o_ref):
    # One TM-row batch tile per grid step; weights are VMEM-resident across steps.
    x = x_ref[...]                                                   # bf16 (TM, in)
    h1 = jnp.tanh(
        jnp.dot(x, w1_ref[...], preferred_element_type=jnp.float32) + b1_ref[...]
    )
    # bf16 feed to the next MXU pass (cheap VALU cast; intermediates never touch HBM).
    h1 = h1.astype(w2_ref.dtype)
    h2 = jnp.tanh(
        jnp.dot(h1, w2_ref[...], preferred_element_type=jnp.float32) + b2_ref[...]
    )
    h2 = h2.astype(w3_ref.dtype)
    out = jnp.dot(h2, w3_ref[...], preferred_element_type=jnp.float32) + b3_ref[...]
    o_ref[...] = out.astype(o_ref.dtype)                             # lane-dense store


def ffnet_forward(x, params, *, tile_m=1024, compute_dtype=jnp.bfloat16):
    """x: (batch, input_size) float32. params: w1,b1,w2,b2,w3,b3 with wi (in, out), bi (1, out).

    Returns {'y': (batch, output_size)} float32, matching FFNet.forward.
    """
    w1, b1 = params["w1"], params["b1"]
    w2, b2 = params["w2"], params["b2"]
    w3, b3 = params["w3"], params["b3"]

    in_size = w1.shape[0]
    h1_size = w1.shape[1]
    h2_size = w2.shape[1]
    out_size = w3.shape[1]

    # ---- lane-dense zero-padding of hidden / output widths (exact, see header) ----------
    h1_p = _round_up(h1_size, 128)
    h2_p = _round_up(h2_size, 128)
    out_p = _round_up(out_size, 128)

    w1p = jnp.zeros((in_size, h1_p), compute_dtype).at[:, :h1_size].set(
        w1.astype(compute_dtype))
    b1p = jnp.zeros((1, h1_p), jnp.float32).at[:, :h1_size].set(b1.astype(jnp.float32))
    w2p = jnp.zeros((h1_p, h2_p), compute_dtype).at[:h1_size, :h2_size].set(
        w2.astype(compute_dtype))
    b2p = jnp.zeros((1, h2_p), jnp.float32).at[:, :h2_size].set(b2.astype(jnp.float32))
    w3p = jnp.zeros((h2_p, out_p), compute_dtype).at[:h2_size, :out_size].set(
        w3.astype(compute_dtype))
    b3p = jnp.zeros((1, out_p), jnp.float32).at[:, :out_size].set(b3.astype(jnp.float32))

    # ---- batch tiling: TM multiple of 8, batch zero-padded to a TM multiple --------------
    batch = x.shape[0]
    TM = min(int(tile_m), _round_up(batch, 8))
    batch_p = _round_up(batch, TM)
    xp = x.astype(compute_dtype)
    if batch_p != batch:
        xp = jnp.pad(xp, ((0, batch_p - batch), (0, 0)))

    grid = (batch_p // TM,)

    x_spec = pl.BlockSpec((TM, in_size), lambda i: (i, 0))
    out_spec = pl.BlockSpec((TM, out_p), lambda i: (i, 0))
    # Constant index_map -> weights/biases resident in VMEM across grid steps.
    w1_spec = pl.BlockSpec((in_size, h1_p), lambda i: (0, 0))
    b1_spec = pl.BlockSpec((1, h1_p), lambda i: (0, 0))
    w2_spec = pl.BlockSpec((h1_p, h2_p), lambda i: (0, 0))
    b2_spec = pl.BlockSpec((1, h2_p), lambda i: (0, 0))
    w3_spec = pl.BlockSpec((h2_p, out_p), lambda i: (0, 0))
    b3_spec = pl.BlockSpec((1, out_p), lambda i: (0, 0))

    # ---- cost estimate (helps XLA schedule around the custom call) -----------------------
    flops = 2 * batch_p * (in_size * h1_p + h1_p * h2_p + h2_p * out_p)
    transcendentals = batch_p * (h1_p + h2_p)
    weight_bytes = ((w1p.size + w2p.size + w3p.size) * 2
                    + (b1p.size + b2p.size + b3p.size) * 4)
    bytes_accessed = batch_p * (in_size * 2 + out_p * 4) + weight_bytes
    cost = pl.CostEstimate(flops=int(flops),
                           transcendentals=int(transcendentals),
                           bytes_accessed=int(bytes_accessed))

    # ---- VMEM budget: double-buffered x/out tiles + resident weights + live intermediates,
    #      clamped with headroom against v7x's 64 MiB physical VMEM ------------------------
    tile_bytes = 2 * (TM * in_size * 2 + TM * out_p * 4)           # double-buffered x / out
    interm_bytes = 3 * TM * (h1_p + h2_p) * 4                      # h1/h2 (f32 + bf16 copies)
    vmem_needed = 2 * weight_bytes + tile_bytes + interm_bytes
    vmem_limit = int(min(48 * 2**20, max(16 * 2**20, 4 * vmem_needed)))

    out = pl.pallas_call(
        _ffnet_kernel,
        out_shape=jax.ShapeDtypeStruct((batch_p, out_p), jnp.float32),
        grid=grid,
        in_specs=[x_spec, w1_spec, b1_spec, w2_spec, b2_spec, w3_spec, b3_spec],
        out_specs=out_spec,
        compiler_params=pltpu.CompilerParams(
            dimension_semantics=("parallel",),      # v7x: shard batch tiles across 2 TCs
            vmem_limit_bytes=vmem_limit,
        ),
        cost_estimate=cost,
    )(xp, w1p, b1p, w2p, b2p, w3p, b3p)

    return {"y": out[:batch, :out_size]}


# Jitted entry point: padding / slicing plumbing fuses with the custom call.
ffnet_forward_jit = jax.jit(ffnet_forward, static_argnames=("tile_m", "compute_dtype"))


def init_ffnet_params(key, input_size, output_size, hidden_sizes=(64, 64)):
    """Deterministic synthetic init (PyTorch nn.Linear default-style uniform bound)."""
    sizes = (input_size,) + tuple(hidden_sizes) + (output_size,)
    params = {}
    keys = jax.random.split(key, 2 * (len(sizes) - 1))
    for i in range(len(sizes) - 1):
        fan_in, fan_out = sizes[i], sizes[i + 1]
        bound = 1.0 / jnp.sqrt(fan_in)
        w = jax.random.uniform(keys[2 * i], (fan_in, fan_out), jnp.float32, -bound, bound)
        b = jax.random.uniform(keys[2 * i + 1], (1, fan_out), jnp.float32, -bound, bound)
        params[f"w{i + 1}"] = w  # stored transposed: (in, out)
        params[f"b{i + 1}"] = b
    return params


def ffnet_reference_f32(x, params):
    h = jnp.tanh(x @ params["w1"] + params["b1"])
    h = jnp.tanh(h @ params["w2"] + params["b2"])
    return h @ params["w3"] + params["b3"]


def ffnet_reference_bf16(x, params):
    """Same numerics as the kernel (bf16 operands, f32 accumulation)."""
    c = jnp.bfloat16
    h = jnp.tanh(jnp.dot(x.astype(c), params["w1"].astype(c),
                         preferred_element_type=jnp.float32) + params["b1"])
    h = jnp.tanh(jnp.dot(h.astype(c), params["w2"].astype(c),
                         preferred_element_type=jnp.float32) + params["b2"])
    return jnp.dot(h.astype(c), params["w3"].astype(c),
                   preferred_element_type=jnp.float32) + params["b3"]


if __name__ == "__main__":
    key = jax.random.PRNGKey(0)
    k_x, k_p, k_x2 = jax.random.split(key, 3)

    # --- small test matching the module's default config --------------------------------
    batch, input_size, output_size = 8, 16, 8
    x = jax.random.normal(k_x, (batch, input_size), jnp.float32)
    params = init_ffnet_params(k_p, input_size, output_size, hidden_sizes=(64, 64))

    y = jax.block_until_ready(ffnet_forward_jit(x, params)["y"])
    assert y.shape == (batch, output_size)
    assert jnp.allclose(y, ffnet_reference_bf16(x, params), atol=2e-3, rtol=2e-3), \
        "mismatch vs bf16/f32-acc reference"
    assert jnp.allclose(y, ffnet_reference_f32(x, params), atol=5e-2, rtol=5e-2), \
        "mismatch vs f32 reference"

    # --- ragged / multi-tile batch exercises the grid + padding path --------------------
    batch2 = 300
    x2 = jax.random.normal(k_x2, (batch2, input_size), jnp.float32)
    y2 = jax.block_until_ready(ffnet_forward_jit(x2, params, tile_m=128)["y"])
    assert y2.shape == (batch2, output_size)
    assert jnp.allclose(y2, ffnet_reference_bf16(x2, params), atol=2e-3, rtol=2e-3), \
        "ragged-batch mismatch vs bf16/f32-acc reference"

    # TODO(synk): ll_activation / ll_activation_range and the hidden_sizes=None
    # (pure learnable-parameter) branch are not exercised by the default FFNet config.
    print("KERNEL_OK")
</pallas_src>

<mosaic_0001>
module attributes {stable_mosaic.version = 11 : i64} {
  func.func @_ffnet_kernel(%arg0: i32, %arg1: memref<8x16xbf16, #tpu.memory_space<vmem>>, %arg2: memref<16x128xbf16, #tpu.memory_space<vmem>>, %arg3: memref<1x128xf32, #tpu.memory_space<vmem>>, %arg4: memref<128x128xbf16, #tpu.memory_space<vmem>>, %arg5: memref<1x128xf32, #tpu.memory_space<vmem>>, %arg6: memref<128x128xbf16, #tpu.memory_space<vmem>>, %arg7: memref<1x128xf32, #tpu.memory_space<vmem>>, %arg8: memref<8x128xf32, #tpu.memory_space<vmem>>) attributes {dimension_semantics = [#tpu.dimension_semantics<parallel>], iteration_bounds = array<i64: 1>, scalar_prefetch = 0 : i64, scratch_operands = 0 : i64, tpu.core_type = #tpu.core_type<tc>, window_params = [{transform_indices = @transform_0, window_bounds = array<i64: 8, 16>}, {pipeline_mode = #tpu.pipeline_mode<synchronous>, transform_indices = @transform_1, window_bounds = array<i64: 16, 128>}, {pipeline_mode = #tpu.pipeline_mode<synchronous>, transform_indices = @transform_2, window_bounds = array<i64: 1, 128>}, {pipeline_mode = #tpu.pipeline_mode<synchronous>, transform_indices = @transform_3, window_bounds = array<i64: 128, 128>}, {pipeline_mode = #tpu.pipeline_mode<synchronous>, transform_indices = @transform_4, window_bounds = array<i64: 1, 128>}, {pipeline_mode = #tpu.pipeline_mode<synchronous>, transform_indices = @transform_5, window_bounds = array<i64: 128, 128>}, {pipeline_mode = #tpu.pipeline_mode<synchronous>, transform_indices = @transform_6, window_bounds = array<i64: 1, 128>}, {transform_indices = @transform_7, window_bounds = array<i64: 8, 128>}]} {
    %c0 = arith.constant 0 : index
    %c0_0 = arith.constant 0 : index
    %0 = vector.load %arg1[%c0, %c0_0] : memref<8x16xbf16, #tpu.memory_space<vmem>>, vector<8x16xbf16>
    %c0_1 = arith.constant 0 : index
    %c0_2 = arith.constant 0 : index
    %1 = vector.load %arg2[%c0_1, %c0_2] : memref<16x128xbf16, #tpu.memory_space<vmem>>, vector<16x128xbf16>
    %cst = arith.constant dense<0.000000e+00> : vector<8x128xf32>
    %2 = tpu.matmul %0, %1, %cst {dimension_numbers = #tpu.dot_dimension_numbers<[1], [0], [0], [1], [0, 0, 1, 1], [], []>} : vector<8x16xbf16>, vector<16x128xbf16>, vector<8x128xf32> -> vector<8x128xf32>
    %c0_3 = arith.constant 0 : index
    %c0_4 = arith.constant 0 : index
    %3 = vector.load %arg3[%c0_3, %c0_4] : memref<1x128xf32, #tpu.memory_space<vmem>>, vector<1x128xf32>
    %4 = vector.broadcast %3 : vector<1x128xf32> to vector<8x128xf32>
    %5 = arith.addf %2, %4 : vector<8x128xf32>
    %6 = math.tanh %5 : vector<8x128xf32>
    %7 = arith.truncf %6 : vector<8x128xf32> to vector<8x128xbf16>
    %c0_5 = arith.constant 0 : index
    %c0_6 = arith.constant 0 : index
    %8 = vector.load %arg4[%c0_5, %c0_6] : memref<128x128xbf16, #tpu.memory_space<vmem>>, vector<128x128xbf16>
    %cst_7 = arith.constant dense<0.000000e+00> : vector<8x128xf32>
    %9 = tpu.matmul %7, %8, %cst_7 {dimension_numbers = #tpu.dot_dimension_numbers<[1], [0], [0], [1], [0, 0, 1, 1], [], []>} : vector<8x128xbf16>, vector<128x128xbf16>, vector<8x128xf32> -> vector<8x128xf32>
    %c0_8 = arith.constant 0 : index
    %c0_9 = arith.constant 0 : index
    %10 = vector.load %arg5[%c0_8, %c0_9] : memref<1x128xf32, #tpu.memory_space<vmem>>, vector<1x128xf32>
    %11 = vector.broadcast %10 : vector<1x128xf32> to vector<8x128xf32>
    %12 = arith.addf %9, %11 : vector<8x128xf32>
    %13 = math.tanh %12 : vector<8x128xf32>
    %14 = arith.truncf %13 : vector<8x128xf32> to vector<8x128xbf16>
    %c0_10 = arith.constant 0 : index
    %c0_11 = arith.constant 0 : index
    %15 = vector.load %arg6[%c0_10, %c0_11] : memref<128x128xbf16, #tpu.memory_space<vmem>>, vector<128x128xbf16>
    %cst_12 = arith.constant dense<0.000000e+00> : vector<8x128xf32>
    %16 = tpu.matmul %14, %15, %cst_12 {dimension_numbers = #tpu.dot_dimension_numbers<[1], [0], [0], [1], [0, 0, 1, 1], [], []>} : vector<8x128xbf16>, vector<128x128xbf16>, vector<8x128xf32> -> vector<8x128xf32>
    %c0_13 = arith.constant 0 : index
    %c0_14 = arith.constant 0 : index
    %17 = vector.load %arg7[%c0_13, %c0_14] : memref<1x128xf32, #tpu.memory_space<vmem>>, vector<1x128xf32>
    %18 = vector.broadcast %17 : vector<1x128xf32> to vector<8x128xf32>
    %19 = arith.addf %16, %18 : vector<8x128xf32>
    %c0_15 = arith.constant 0 : index
    %c0_16 = arith.constant 0 : index
    %20 = vector.load %arg8[%c0_15, %c0_16] : memref<8x128xf32, #tpu.memory_space<vmem>>, vector<8x128xf32>
    tpu.vector_store %arg8[%c0_15, %c0_16], %19 {strides = array<i32>} : memref<8x128xf32, #tpu.memory_space<vmem>>, vector<8x128xf32>,
    return
  }
  func.func @transform_0(%arg0: i32) -> (i32, i32) {
    %c0_i32 = arith.constant 0 : i32
    %c0_i32_0 = arith.constant 0 : i32
    return %arg0, %c0_i32 : i32, i32
  }
  func.func @transform_1(%arg0: i32) -> (i32, i32) {
    %c0_i32 = arith.constant 0 : i32
    %c0_i32_0 = arith.constant 0 : i32
    %c0_i32_1 = arith.constant 0 : i32
    return %c0_i32, %c0_i32_0 : i32, i32
  }
  func.func @transform_2(%arg0: i32) -> (i32, i32) {
    %c0_i32 = arith.constant 0 : i32
    %c0_i32_0 = arith.constant 0 : i32
    %c0_i32_1 = arith.constant 0 : i32
    return %c0_i32, %c0_i32_0 : i32, i32
  }
  func.func @transform_3(%arg0: i32) -> (i32, i32) {
    %c0_i32 = arith.constant 0 : i32
    %c0_i32_0 = arith.constant 0 : i32
    %c0_i32_1 = arith.constant 0 : i32
    return %c0_i32, %c0_i32_0 : i32, i32
  }
  func.func @transform_4(%arg0: i32) -> (i32, i32) {
    %c0_i32 = arith.constant 0 : i32
    %c0_i32_0 = arith.constant 0 : i32
    %c0_i32_1 = arith.constant 0 : i32
    return %c0_i32, %c0_i32_0 : i32, i32
  }
  func.func @transform_5(%arg0: i32) -> (i32, i32) {
    %c0_i32 = arith.constant 0 : i32
    %c0_i32_0 = arith.constant 0 : i32
    %c0_i32_1 = arith.constant 0 : i32
    return %c0_i32, %c0_i32_0 : i32, i32
  }
  func.func @transform_6(%arg0: i32) -> (i32, i32) {
    %c0_i32 = arith.constant 0 : i32
    %c0_i32_0 = arith.constant 0 : i32
    %c0_i32_1 = arith.constant 0 : i32
    return %c0_i32, %c0_i32_0 : i32, i32
  }
  func.func @transform_7(%arg0: i32) -> (i32, i32) {
    %c0_i32 = arith.constant 0 : i32
    %c0_i32_0 = arith.constant 0 : i32
    return %arg0, %c0_i32 : i32, i32
  }
}

</mosaic_0001>

<bundles_post_ra>
// kernel: ffnet_forward.1
= control target key start
LH: loop header
LB: loop body
LE: loop exit
PB: predicated region body
PF: predicated region fallthrough
CT: control target
= control target key end

     0   :  { %v462_v1 = vmov 0.0   ;;  %vm463_vm0 = vmmov 0   ;;  %vm44_vm1 = vcmask 130048   ;;  %s591_s0 = inlined_call_operand.vmem [shape: bf16[8,16], index: 0, kind: input, shape index: {}]   ;;  %s592_s1 = inlined_call_operand.vmem [shape: bf16[16,128], index: 1, kind: input, shape index: {}]   ;;  %s593_s2 = inlined_call_operand.vmem [shape: f32[1,128], index: 2, kind: input, shape index: {}]   ;;  %s594_s3 = inlined_call_operand.vmem [shape: bf16[128,128], index: 3, kind: input, shape index: {}]   ;;  %s595_s4 = inlined_call_operand.vmem [shape: f32[1,128], index: 4, kind: input, shape index: {}]   ;;  %s596_s5 = inlined_call_operand.vmem [shape: bf16[128,128], index: 5, kind: input, shape index: {}]   ;;  %s597_s6 = inlined_call_operand.vmem [shape: f32[1,128], index: 6, kind: input, shape index: {}]   ;;  %s598_s7 = inlined_call_operand.hbm [shape: f32[8,128], index: 7, kind: output, shape index: {}]  }
   0x1   :  { %v419_v0 = vld [vmem:[%s592_s1] sm:$0xff]   ;;  %370 = vmatprep.subr.bf16.mxu0 %v462_v1  ;;  %376 = vmatprep.subr.bf16.mxu1 %v462_v1  ;;  %v420_v3 = vld [vmem:[%s594_s3 + $0x38] sm:$0xff]   ;;  %v421_v4 = vld [vmem:[%s594_s3 + $0x30] sm:$0xff]  }
   0x2   :  { %v28_v2 = vld [vmem:[%s591_s0] sm:$0xf]  ;;  %371 = vmatpush3.bf16.msra.mxu0 %v419_v0  ;;  %372 = vmatprep.mubr.msk.bf16.mxu0 %vm463_vm0, %v462_v1  ;;  %v422_v5 = vld [vmem:[%s594_s3 + $0x28] sm:$0xff]  }
   0x3   :  { %392 = vmatprep.mubr.msk.bf16.mxu1 %vm463_vm0, %v462_v1  ;;  %396 = vmatprep.subr.bf16.mxu0 %v462_v1 }
   0x4   :  { %377 = vmatpush3.bf16.msra.mxu1 %v420_v3 }
   0x5   :  { %373 = vmatmul.mubr.msk.bf16.vlgmr.msra.gmra.mxu0 %vm44_vm1, %v28_v2  ;;  %378 = vmatprep.subr.bf16.mxu1 %v462_v1 }
   0x6   :  { %412 = vmatprep.mubr.msk.bf16.mxu0 %vm463_vm0, %v462_v1 }
   0x8   :  { %379 = vmatpush3.bf16.msra.mxu1 %v421_v4 }
   0x9   :  { %380 = vmatprep.subr.bf16.mxu1 %v462_v1 }
   0xc   :  { %381 = vmatpush3.bf16.msra.mxu1 %v422_v5 }
   0xd   :  { %382 = vmatprep.subr.bf16.mxu1 %v462_v1 }
   0xe   :  { %12 = vsyncpa [#allocation3], 0  ;;  %v423_v6 = vld [vmem:[%s594_s3 + $0x20] sm:$0xff]   ;;  %v424_v7 = vld [vmem:[%s594_s3 + $0x18] sm:$0xff]   ;;  %s464_s14 = smov [#allocation2]  }
   0xf   :  { %v425_v8 = vld [vmem:[%s594_s3 + $0x10] sm:$0xff]   ;;  %v426_v9 = vld [vmem:[%s594_s3 + $0x8] sm:$0xff]   ;;  %v427_v10 = vld [vmem:[%s594_s3] sm:$0xff]  }
  0x10   :  { %383 = vmatpush3.bf16.msra.mxu1 %v423_v6  ;;  %v428_v11 = vld [vmem:[%s596_s5 + $0x38] sm:$0xff]   ;;  %v429_v12 = vld [vmem:[%s596_s5 + $0x30] sm:$0xff]   ;;  %v430_v13 = vld [vmem:[%s596_s5 + $0x28] sm:$0xff]  }
  0x11   :  { %384 = vmatprep.subr.bf16.mxu1 %v462_v1  ;;  %397 = vmatpush3.bf16.msra.mxu0 %v428_v11  ;;  %v329_v14 = vld [vmem:[%s593_s2] ss:$0 sm:$0xff]  ;;  %v432_v23 = vld [vmem:[%s596_s5 + $0x18] sm:$0xff]   ;;  %v433_v24 = vld [vmem:[%s596_s5 + $0x10] sm:$0xff]  }
  0x12   :  { %398 = vmatprep.subr.bf16.mxu0 %v462_v1  ;;  %v431_v22 = vld [vmem:[%s596_s5 + $0x20] sm:$0xff]   ;;  %v434_v25 = vld [vmem:[%s596_s5 + $0x8] sm:$0xff]  }
  0x13   :  { %v435_v26 = vld [vmem:[%s596_s5] sm:$0xff]   ;;  %s321_s5 = sshll.u32 %s464_s14, 4  ;;  %s322_s5 = int_to_ptr.vmem [resolvable:$true] %s321_s5 }
  0x14   :  { %385 = vmatpush3.bf16.msra.mxu1 %v424_v7  ;;  %v332_v27 = vld [vmem:[%s595_s4] ss:$0 sm:$0xff]  ;;  %s440_s4 = scalar_lea.vmem %s322_s5, 128  ;;  %p445_p1 = scmp.lt.s32.totalorder %s322_s5, %s322_s5 }
  0x15   :  { %386 = vmatprep.subr.bf16.mxu1 %v462_v1  ;;  %399 = vmatpush3.bf16.msra.mxu0 %v429_v12  ;;  %v341_v35 = vld [vmem:[%s597_s6] ss:$0 sm:$0xff]  ;;  %p441_p0 = scmp.ne.s32.totalorder %s322_s5, %s440_s4  ;;  %p446_p2 = scmp.lt.s32.totalorder %s440_s4, %s440_s4 }
  0x16   :  { %400 = vmatprep.subr.bf16.mxu0 %v462_v1 }
  0x17   :  { %p447_p3 = por %p446_p2, %p445_p1 }
  0x18   :  { %387 = vmatpush3.bf16.msra.mxu1 %v425_v8 }
  0x19   :  { %388 = vmatprep.subr.bf16.mxu1 %v462_v1  ;;  %401 = vmatpush3.bf16.msra.mxu0 %v430_v13  ;;  %p448_p4 = pnand %p447_p3, %p441_p0 }
  0x1a   :  { %402 = vmatprep.subr.bf16.mxu0 %v462_v1 }
  0x1c   :  { %389 = vmatpush3.bf16.msra.mxu1 %v426_v9 }
  0x1d   :  { %390 = vmatprep.subr.bf16.mxu1 %v462_v1  ;;  %403 = vmatpush3.bf16.msra.mxu0 %v431_v22 }
  0x1e   :  { %404 = vmatprep.subr.bf16.mxu0 %v462_v1 }
  0x20   :  { %391 = vmatpush3.bf16.msra.mxu1 %v427_v10 }
  0x21   :  { %405 = vmatpush3.bf16.msra.mxu0 %v432_v23 }
  0x22   :  { %406 = vmatprep.subr.bf16.mxu0 %v462_v1 }
  0x25   :  { %407 = vmatpush3.bf16.msra.mxu0 %v433_v24 }
  0x26   :  { %408 = vmatprep.subr.bf16.mxu0 %v462_v1 }
  0x29   :  { %409 = vmatpush3.bf16.msra.mxu0 %v434_v25 }
  0x2a   :  { %410 = vmatprep.subr.bf16.mxu0 %v462_v1 }
  0x2d   :  { %411 = vmatpush3.bf16.msra.mxu0 %v435_v26 }
  0xc5   :  { %v82_v15 = vpop.f32.mrf.mxu0 }
  0xc6   :  { %v83_v16 = vadd.f32 %v329_v14, %v82_v15 }
  0xc7   :  { %v374_v17 = vpop.f32.mrf.mxu0 }
  0xc8   :  { %436 = vtanh.f32 %v83_v16 }
  0xc9   :  { %v85_v18 = vpop.f32.mrf.mxu0 }
  0xcb   :  { %v375_v19 = vpop.f32.mrf.mxu0 }
  0xd5   :  { %v437_v20 = vpop.eup %436 }
  0xd6   :  { %v89_v21 = vpack.c.bf16 %v437_v20, %v437_v20 }
  0xd8   :  { %393 = vmatmul.mubr.bf16.vlgmr.msra.gmra.mxu1 %v89_v21 }
 0x198   :  { %v195_v28 = vpop.f32.mrf.mxu1 }
 0x199   :  { %v196_v29 = vadd.f32 %v332_v27, %v195_v28 }
 0x19a   :  { %v394_v30 = vpop.f32.mrf.mxu1 }
 0x19b   :  { %438 = vtanh.f32 %v196_v29 }
 0x19c   :  { %v198_v31 = vpop.f32.mrf.mxu1 }
 0x19e   :  { %v395_v32 = vpop.f32.mrf.mxu1 }
 0x1a8   :  { %v439_v33 = vpop.eup %438 }
 0x1a9   :  { %v202_v34 = vpack.c.bf16 %v439_v33, %v439_v33 }
 0x1ab   :  { %413 = vmatmul.mubr.bf16.vlgmr.msra.gmra.mxu0 %v202_v34 }
 0x26b   :  { %v308_v36 = vpop.f32.mrf.mxu0 }
 0x26c   :  { %v309_v37 = vadd.f32 %v341_v35, %v308_v36 }
 0x26d   :  { %v414_v38 = vpop.f32.mrf.mxu0 }
 0x26e   :  { %314 = vst [vmem:[#allocation2] sm:$0xff] %v309_v37 }
 0x26f   :  { %v311_v39 = vpop.f32.mrf.mxu0 }
 0x270   :  { %451 = shalt.err (!%p448_p4)
}
 0x271   :  { %324 = dma.vmem_to_hbm [thread:$0]  %s322_s5, 128, %s598_s7, [#allocation3]   ;;  %v415_v40 = vpop.f32.mrf.mxu0 }
 0x272   :  { %460 = dma.done.wait [#allocation3], 128  }
 0x273   :  { %461 = vsyncadd [#allocation3], 4294967168 }
 0x274   :  { %328 = vsyncpa [#allocation3], 1 }

</bundles_post_ra>
